<compile_context>
chip_gen: v7x
topology: tpu7x:2x2x1
jax: 0.10.0
libtpu: 0.0.40
codegen_flags: <defaults>
</compile_context>

<pallas_src>
import math

import jax
import jax.numpy as jnp
from jax import lax
from jax.experimental import pallas as pl
from jax.experimental.pallas import tpu as pltpu

MULTIPLIER = 1000.0                                # DIB-R linear_rasterizer scale
DELTA = 7000.0                                     # DIB-R soft-silhouette sharpness
_COEF = (MULTIPLIER * MULTIPLIER) / DELTA
_SOFT_RADIUS = math.sqrt(30.0 / _COEF)             # exp(-30) ~ 1e-13 cutoff (~0.46 NDC)
_NEG = -1.0e30                                     # z-buffer "empty" sentinel
_EPS_AREA = 1e-10
_K = 19                                            # per-face attribute count


def _round_up(x, m):
    return ((x + m - 1) // m) * m


def _next_pow2(x):
    return 1 << max(0, (x - 1)).bit_length()


def _recip(x):
    # approx EUP reciprocal + one Newton step (tiny (TF,1)/(1,P) operands)
    r = pl.reciprocal(x, approx=True)
    return r * (2.0 - x * r)


def _chip_config():
    """(soft_dtype, tf_cap, vmem_limit_bytes) chosen per TPU generation."""
    kind = ""
    try:
        kind = jax.devices()[0].device_kind.lower()
    except Exception:
        pass
    if "v7" in kind or "tpu7" in kind:
        return jnp.bfloat16, 128, 48 * 1024 * 1024   # 64 MiB/TC physical on v7x
    if "v6" in kind:
        return jnp.bfloat16, 128, 64 * 1024 * 1024
    if "v5" in kind:
        return jnp.float32, 64, 64 * 1024 * 1024     # v5e: single vst slot, no bf16 VALU
    return jnp.float32, 64, 32 * 1024 * 1024         # unknown backend: conservative


# --------------------------------------------------------------------------- #
# 1. perspective projection kernel (channel-major: vertices on lanes)
# --------------------------------------------------------------------------- #
def _project_kernel(pts_ref, rot_ref, pos_ref, proj_ref, cam_ref, xy_ref):
    pts = pts_ref[0]            # (3, P)
    rot = rot_ref[0]            # (3, 3)
    pos = pos_ref[0]            # (3, 1)
    proj = proj_ref[...]        # (3, 1)

    pc = pts - pos
    pcx, pcy, pcz = pc[0:1, :], pc[1:2, :], pc[2:3, :]

    def cam_row(i):             # row i of rot @ (p - pos) == ((p - pos) @ rot^T)_i
        return (rot[i:i + 1, 0:1] * pcx +
                rot[i:i + 1, 1:2] * pcy +
                rot[i:i + 1, 2:3] * pcz)

    c0, c1, c2 = cam_row(0), cam_row(1), cam_row(2)
    cam_ref[0, 0:1, :] = c0
    cam_ref[0, 1:2, :] = c1
    cam_ref[0, 2:3, :] = c2

    z = c2 * proj[2:3, 0:1]
    inv_z = _recip(z)                                   # perspective divide on the EUP
    xy_ref[0, 0:1, :] = c0 * proj[0:1, 0:1] * inv_z
    xy_ref[0, 1:2, :] = c1 * proj[1:2, 0:1] * inv_z


def project_points(pts_t_bx3xp, camera_rot_bx3x3, camera_pos_bx3x1, camera_proj_3x1):
    B, _, P = pts_t_bx3xp.shape
    return pl.pallas_call(
        _project_kernel,
        out_shape=(jax.ShapeDtypeStruct((B, 3, P), jnp.float32),
                   jax.ShapeDtypeStruct((B, 2, P), jnp.float32)),
        grid=(B,),
        in_specs=[pl.BlockSpec((1, 3, P), lambda b: (b, 0, 0)),
                  pl.BlockSpec((1, 3, 3), lambda b: (b, 0, 0)),
                  pl.BlockSpec((1, 3, 1), lambda b: (b, 0, 0)),
                  pl.BlockSpec((3, 1), lambda b: (0, 0))],
        out_specs=(pl.BlockSpec((1, 3, P), lambda b: (b, 0, 0)),
                   pl.BlockSpec((1, 2, P), lambda b: (b, 0, 0))),
        compiler_params=pltpu.CompilerParams(dimension_semantics=("parallel",)),
    )(pts_t_bx3xp, camera_rot_bx3x3, camera_pos_bx3x1, camera_proj_3x1)


# --------------------------------------------------------------------------- #
# 2. face normal + datanormalize kernel (channel-major: faces on lanes)
# --------------------------------------------------------------------------- #
def _normal_kernel(p0_ref, p1_ref, p2_ref, n1_ref, nz_ref):
    p0, p1, p2 = p0_ref[0], p1_ref[0], p2_ref[0]                 # (3, F)
    v01 = p1 - p0
    v02 = p2 - p0
    ax_, ay_, az_ = v01[0:1, :], v01[1:2, :], v01[2:3, :]
    bx_, by_, bz_ = v02[0:1, :], v02[1:2, :], v02[2:3, :]
    nx = ay_ * bz_ - az_ * by_
    ny = az_ * bx_ - ax_ * bz_
    nz = ax_ * by_ - ay_ * bx_
    inv = lax.rsqrt(nx * nx + ny * ny + nz * nz + 1e-16)          # EUP rsqrt
    n1_ref[0, 0:1, :] = nx * inv
    n1_ref[0, 1:2, :] = ny * inv
    n1_ref[0, 2:3, :] = nz * inv
    nz_ref[0] = nz


def face_normals(pf0_t, pf1_t, pf2_t):
    B, _, F = pf0_t.shape
    spec = pl.BlockSpec((1, 3, F), lambda b: (b, 0, 0))
    return pl.pallas_call(
        _normal_kernel,
        out_shape=(jax.ShapeDtypeStruct((B, 3, F), jnp.float32),
                   jax.ShapeDtypeStruct((B, 1, F), jnp.float32)),
        grid=(B,),
        in_specs=[spec, spec, spec],
        out_specs=(pl.BlockSpec((1, 3, F), lambda b: (b, 0, 0)),
                   pl.BlockSpec((1, 1, F), lambda b: (b, 0, 0))),
        compiler_params=pltpu.CompilerParams(dimension_semantics=("parallel",)),
    )(pf0_t, pf1_t, pf2_t)


# --------------------------------------------------------------------------- #
# 3. tiled linear rasterizer (DIB-R forward), with scalar-prefetch bbox culling
# --------------------------------------------------------------------------- #
# per-face attribute columns (K = 19, faces on sublanes):
#   0:ax 1:ay 2:bx 3:by 4:cx 5:cy   projected 2-D vertices
#   6:z0 7:z1 8:z2                  camera-space depths
#   9:nz                            face-normal z (backface cull; padded faces = -1)
#  10..12 / 13..15 / 16..18         RGB of vertex 0 / 1 / 2
def _make_raster_kernel(height, width, tp, tf, n_chunks, batch, resident, soft_dtype):
    coef = _COEF
    tile_base = batch * n_chunks * 4

    def kernel(bb_ref, attr_ref, out_ref, zbuf_ref, pxpy_ref):
        b = pl.program_id(0)
        j = pl.program_id(1)
        kk = pl.program_id(2)

        # ---- per-(b, pixel-tile) init: accumulators + hoisted pixel coordinates ----
        @pl.when(kk == 0)
        def _init():
            out_ref[0:4, :] = jnp.zeros((4, tp), jnp.float32)    # rgb + hard mask
            out_ref[4:5, :] = jnp.ones((1, tp), jnp.float32)     # running prod(1 - p_f)
            zbuf_ref[...] = jnp.full((1, tp), _NEG, jnp.float32)
            lane = lax.broadcasted_iota(jnp.int32, (1, tp), 1)
            pix = j * tp + lane
            colp = (pix % width).astype(jnp.float32)
            rowp = (pix // width).astype(jnp.float32)
            pxpy_ref[0:1, :] = (2.0 * colp + 1.0 - width) / width
            pxpy_ref[1:2, :] = (height - 2.0 * rowp - 1.0) / height

        # ---- chunk-bbox vs tile-bbox culling (SMEM scalar prefetch table) ----
        cb = (b * n_chunks + kk) * 4
        tb = tile_base + j * 4
        overlap = ((bb_ref[cb + 0] <= bb_ref[tb + 1]) &
                   (bb_ref[cb + 1] >= bb_ref[tb + 0]) &
                   (bb_ref[cb + 2] <= bb_ref[tb + 3]) &
                   (bb_ref[cb + 3] >= bb_ref[tb + 2]))

        @pl.when(overlap)
        def _compute():
            # resident slab: dynamic major-axis chunk select (no DMA between steps)
            A = attr_ref[kk] if resident else attr_ref[0]        # (TF, 19)

            def col(c):
                return A[:, c:c + 1]                             # (TF, 1)

            ax, ay = col(0), col(1)
            bx, by = col(2), col(3)
            cx, cy = col(4), col(5)
            z0, z1, z2 = col(6), col(7), col(8)
            nz = col(9)

            px = pxpy_ref[0:1, :]                                # (1, TP)
            py = pxpy_ref[1:2, :]

            # per-face affine coefficients (all (TF,1); nearly free) so that
            # w1, w2, zdepth are each a*px + b*py + c on the big (TF,TP) arrays
            m = bx - ax
            p_ = by - ay
            n = cx - ax
            q = cy - ay
            k3 = m * q - n * p_                                  # signed 2x area
            k3abs = jnp.abs(k3)
            k3safe = jnp.where(k3 >= 0.0, jnp.maximum(k3abs, _EPS_AREA),
                               -jnp.maximum(k3abs, _EPS_AREA))
            inv_k3 = _recip(k3safe)
            visible = nz >= 0.0                                  # front-facing
            valid = visible & (k3abs > _EPS_AREA)                # degenerate guard

            a1 = q * inv_k3
            b1 = -n * inv_k3
            c1_ = (n * ay - q * ax) * inv_k3
            a2 = -p_ * inv_k3
            b2 = m * inv_k3
            c2_ = (p_ * ax - m * ay) * inv_k3

            w1 = a1 * px + b1 * py + c1_                         # (TF, TP)
            w2 = a2 * px + b2 * py + c2_
            w0 = 1.0 - w1 - w2
            inside = (w0 >= 0.0) & (w1 >= 0.0) & (w2 >= 0.0) & valid

            # z-buffer candidate: camera looks down -z => nearest face has max z
            zdepth = z0 + w1 * (z1 - z0) + w2 * (z2 - z0)
            zmask = jnp.where(inside, zdepth, _NEG)
            zmax_c = jnp.max(zmask, axis=0, keepdims=True)       # (1, TP)

            # chunk winner = lowest face index among faces at the chunk z-max
            fidx = lax.broadcasted_iota(jnp.int32, (tf, tp), 0).astype(jnp.float32)
            widx = jnp.min(jnp.where(zmask >= zmax_c, fidx, float(tf)),
                           axis=0, keepdims=True)
            onehot = (fidx == widx).astype(jnp.float32)

            def chan(c):                                         # winner's color
                v0 = col(10 + c)
                interp = v0 + w1 * (col(13 + c) - v0) + w2 * (col(16 + c) - v0)
                return jnp.sum(onehot * interp, axis=0, keepdims=True)

            ones_row = jnp.ones((1, tp), jnp.float32)            # hard-mask channel
            chunk_feat = jnp.concatenate([chan(0), chan(1), chan(2), ones_row], axis=0)

            # streaming z-test across face chunks (strict > keeps earliest chunk)
            take = zmax_c > zbuf_ref[...]
            zbuf_ref[...] = jnp.where(take, zmax_c, zbuf_ref[...])
            out_ref[0:4, :] = jnp.where(take, chunk_feat, out_ref[0:4, :])

            # soft silhouette: squared distance to nearest edge (bf16 on v6e/v7x)
            pxs = px.astype(soft_dtype)
            pys = py.astype(soft_dtype)

            def edge_d2(x0, y0, x1, y1):
                ex = x1 - x0
                ey = y1 - y0
                inv_l2 = _recip(ex * ex + ey * ey + 1e-10)       # f32, (TF,1)
                exs = ex.astype(soft_dtype)
                eys = ey.astype(soft_dtype)
                gxs = (ex * inv_l2).astype(soft_dtype)
                gys = (ey * inv_l2).astype(soft_dtype)
                dx = pxs - x0.astype(soft_dtype)
                dy = pys - y0.astype(soft_dtype)
                tt = jnp.clip(dx * gxs + dy * gys, 0.0, 1.0)
                qx = dx - tt * exs
                qy = dy - tt * eys
                return qx * qx + qy * qy

            d2 = jnp.minimum(jnp.minimum(edge_d2(ax, ay, bx, by),
                                         edge_d2(bx, by, cx, cy)),
                             edge_d2(cx, cy, ax, ay)).astype(jnp.float32)
            d2 = jnp.where(inside, 0.0, d2)
            probf = jnp.where(visible, jnp.exp(-coef * d2), 0.0)

            # product over the chunk faces: tile-aligned tree down to 8 sublanes,
            # then XLU sublane rotates finish the reduction (row 0 holds the product)
            keep = 1.0 - probf                                   # (TF, TP)
            size = tf
            while size > 8:
                half = size // 2
                keep = keep[:half, :] * keep[half:size, :]
                size = half
            keep = keep * pltpu.roll(keep, 4, 0)
            keep = keep * pltpu.roll(keep, 2, 0)
            keep = keep * pltpu.roll(keep, 1, 0)
            out_ref[4:5, :] = out_ref[4:5, :] * keep[0:1, :]

        @pl.when(kk == pl.num_programs(2) - 1)
        def _finalize():
            out_ref[4:5, :] = 1.0 - out_ref[4:5, :]

    return kernel


def rasterize(height, width, slab_b_nc_tf_k, bbox_flat, tp, resident, soft_dtype,
              vmem_limit_bytes):
    B, NC, TF, K = slab_b_nc_tf_k.shape
    assert K == _K
    HW = height * width
    hwp = _round_up(HW, tp)
    n_tiles = hwp // tp
    grid = (B, n_tiles, NC)

    if resident:
        # constant block index across (tile, chunk) axes => DMA only when b changes
        attr_spec = pl.BlockSpec((None, NC, TF, _K), lambda b, j, k, bb: (b, 0, 0, 0))
    else:
        attr_spec = pl.BlockSpec((None, 1, TF, _K), lambda b, j, k, bb: (b, k, 0, 0))

    out = pl.pallas_call(
        _make_raster_kernel(height, width, tp, TF, NC, B, resident, soft_dtype),
        out_shape=jax.ShapeDtypeStruct((B, 5, hwp), jnp.float32),
        grid_spec=pltpu.PrefetchScalarGridSpec(
            num_scalar_prefetch=1,
            grid=grid,
            in_specs=[attr_spec],
            out_specs=pl.BlockSpec((None, 5, tp), lambda b, j, k, bb: (b, 0, j)),
            scratch_shapes=[pltpu.VMEM((1, tp), jnp.float32),    # running z-max
                            pltpu.VMEM((2, tp), jnp.float32)]),  # hoisted px / py
        compiler_params=pltpu.CompilerParams(
            dimension_semantics=("parallel", "parallel", "arbitrary"),
            vmem_limit_bytes=vmem_limit_bytes),
    )(bbox_flat, slab_b_nc_tf_k)
    return out[:, 0:4, :HW], out[:, 4:5, :HW]


# --------------------------------------------------------------------------- #
# scalar-prefetch bbox table (chunk bboxes + tile bboxes, pixel-integer space)
# --------------------------------------------------------------------------- #
def _build_bbox_table(x0, x1, x2, y0, y1, y2, nz, height, width, tf, tp, Fp, hwp):
    B, F = x0.shape
    NC = Fp // tf
    HW = height * width
    n_tiles = hwp // tp
    rad = _SOFT_RADIUS

    vis = nz >= 0.0
    xs_min = jnp.clip(jnp.minimum(jnp.minimum(x0, x1), x2), -4.0, 4.0)
    xs_max = jnp.clip(jnp.maximum(jnp.maximum(x0, x1), x2), -4.0, 4.0)
    ys_min = jnp.clip(jnp.minimum(jnp.minimum(y0, y1), y2), -4.0, 4.0)
    ys_max = jnp.clip(jnp.maximum(jnp.maximum(y0, y1), y2), -4.0, 4.0)
    # back-facing faces contribute nothing anywhere -> exclude from the chunk bbox
    xs_min = jnp.where(vis, xs_min, 4.0)
    xs_max = jnp.where(vis, xs_max, -4.0)
    ys_min = jnp.where(vis, ys_min, 4.0)
    ys_max = jnp.where(vis, ys_max, -4.0)

    pad = Fp - F

    def padto(a, val):
        return jnp.pad(a, ((0, 0), (0, pad)), constant_values=val).reshape(B, NC, tf)

    cxmin = jnp.min(padto(xs_min, 4.0), axis=-1) - rad            # (B, NC)
    cxmax = jnp.max(padto(xs_max, -4.0), axis=-1) + rad
    cymin = jnp.min(padto(ys_min, 4.0), axis=-1) - rad
    cymax = jnp.max(padto(ys_max, -4.0), axis=-1) + rad
    has = jnp.max(padto(vis.astype(jnp.float32), 0.0), axis=-1) > 0.0

    w = float(width)
    h = float(height)
    c_lo = jnp.floor((cxmin * w + w - 1.0) * 0.5).astype(jnp.int32) - 1
    c_hi = jnp.ceil((cxmax * w + w - 1.0) * 0.5).astype(jnp.int32) + 1
    r_lo = jnp.floor((h - cymax * h - 1.0) * 0.5).astype(jnp.int32) - 1
    r_hi = jnp.ceil((h - cymin * h - 1.0) * 0.5).astype(jnp.int32) + 1
    sent = jnp.int32(2 ** 30)
    c_lo = jnp.where(has, c_lo, sent)
    c_hi = jnp.where(has, c_hi, -sent)
    r_lo = jnp.where(has, r_lo, sent)
    r_hi = jnp.where(has, r_hi, -sent)
    chunk_tab = jnp.stack([c_lo, c_hi, r_lo, r_hi], axis=-1).reshape(-1)

    jt = jnp.arange(n_tiles, dtype=jnp.int32)
    p0 = jt * tp
    p1 = jnp.minimum(p0 + tp, HW) - 1
    r0 = p0 // width
    r1 = p1 // width
    multirow = r1 > r0
    c0t = jnp.where(multirow, 0, p0 % width)
    c1t = jnp.where(multirow, width - 1, p1 % width)
    tile_tab = jnp.stack([c0t, c1t, r0, r1], axis=-1).reshape(-1)

    return jnp.concatenate([chunk_tab, tile_tab]).astype(jnp.int32)


# --------------------------------------------------------------------------- #
# VCRender.forward
# --------------------------------------------------------------------------- #
def vcrender_forward(points_bxpx3, faces_fx3, camera_rot, camera_pos, camera_proj,
                     colors_bxpx3, height, width):
    B = points_bxpx3.shape[0]
    F = faces_fx3.shape[0]
    soft_dtype, tf_cap, vmem_limit = _chip_config()

    # perspective_projection (channel-major, lane-dense)
    pts_t = jnp.transpose(points_bxpx3.astype(jnp.float32), (0, 2, 1))      # (B, 3, P)
    rot = camera_rot.astype(jnp.float32)
    pos_t = camera_pos.reshape(B, 3, 1).astype(jnp.float32)
    proj = camera_proj.reshape(3, 1).astype(jnp.float32)
    cam_t, xy_t = project_points(pts_t, rot, pos_t, proj)                   # (B,3,P),(B,2,P)

    i0 = faces_fx3[:, 0]
    i1 = faces_fx3[:, 1]
    i2 = faces_fx3[:, 2]

    # face normals (channel-major)
    pf0, pf1, pf2 = cam_t[:, :, i0], cam_t[:, :, i1], cam_t[:, :, i2]       # (B, 3, F)
    n1_t, nz_t = face_normals(pf0, pf1, pf2)
    normal1_bxfx3 = jnp.transpose(n1_t, (0, 2, 1))                          # (B, F, 3)

    colors = colors_bxpx3.astype(jnp.float32)
    x0, y0 = xy_t[:, 0, i0], xy_t[:, 1, i0]
    x1, y1 = xy_t[:, 0, i1], xy_t[:, 1, i1]
    x2, y2 = xy_t[:, 0, i2], xy_t[:, 1, i2]
    nz = nz_t[:, 0, :]

    # ------------------ tile sizes ------------------
    HW = height * width
    tf = min(tf_cap, max(8, _next_pow2(F)))          # face chunk (power of two)
    Fp = _round_up(F, tf)
    NC = Fp // tf

    tp = min(1024, _round_up(HW, 128))               # lane-dense pixel tile
    # keep >= 2 units of (batch x tile) parallel work so a 2nd TensorCore never idles
    while B * ((HW + tp - 1) // tp) < 2 and tp > 128:
        tp //= 2
    hwp = _round_up(HW, tp)

    # ------------------ per-face attribute slab (B, NC, tf, 19) ------------------
    cols = [x0, y0, x1, y1, x2, y2,
            cam_t[:, 2, i0], cam_t[:, 2, i1], cam_t[:, 2, i2],
            nz,
            colors[:, i0, 0], colors[:, i0, 1], colors[:, i0, 2],
            colors[:, i1, 0], colors[:, i1, 1], colors[:, i1, 2],
            colors[:, i2, 0], colors[:, i2, 1], colors[:, i2, 2]]
    pad = Fp - F
    padded = [jnp.pad(c, ((0, 0), (0, pad)),
                      constant_values=(-1.0 if idx == 9 else 0.0))          # nz pad = -1
              for idx, c in enumerate(cols)]
    slab = jnp.stack(padded, axis=-1).reshape(B, NC, tf, _K)

    # resident slab if the VMEM cost (lane-padded, double-buffered) fits the budget
    resident = (2 * NC * tf * 128 * 4) <= max(vmem_limit // 4, 2 * 1024 * 1024)

    # culling table (chunk bboxes expanded by the soft-prob radius + tile bboxes)
    bbox_flat = _build_bbox_table(x0, x1, x2, y0, y1, y2, nz,
                                  height, width, tf, tp, Fp, hwp)

    feat_b4, prob_b1 = rasterize(height, width, slab, bbox_flat, tp,
                                 resident, soft_dtype, vmem_limit)

    imfeat = jnp.transpose(feat_b4, (0, 2, 1)).reshape(B, height, width, 4)
    improb_bxhxwx1 = prob_b1.reshape(B, height, width, 1)
    imrender = imfeat[:, :, :, :3]
    hardmask = imfeat[:, :, :, 3:]
    return imrender, improb_bxhxwx1, normal1_bxfx3, hardmask


# --------------------------------------------------------------------------- #
# demo
# --------------------------------------------------------------------------- #
if __name__ == "__main__":
    key = jax.random.PRNGKey(0)
    B, H, W = 2, 16, 16

    # unit cube mesh (8 vertices, 12 triangles, outward CCW winding)
    cube_verts = 0.5 * jnp.array(
        [[-1, -1, -1], [1, -1, -1], [1, 1, -1], [-1, 1, -1],
         [-1, -1, 1], [1, -1, 1], [1, 1, 1], [-1, 1, 1]], dtype=jnp.float32)
    faces_fx3 = jnp.array(
        [[4, 5, 6], [4, 6, 7],      # +z (front)
         [1, 0, 3], [1, 3, 2],      # -z (back)
         [0, 4, 7], [0, 7, 3],      # -x
         [5, 1, 2], [5, 2, 6],      # +x
         [7, 6, 2], [7, 2, 3],      # +y
         [0, 1, 5], [0, 5, 4]],     # -y
        dtype=jnp.int32)

    k1, k2 = jax.random.split(key)
    points_bxpx3 = cube_verts[None] + 0.05 * jax.random.normal(k1, (B, 8, 3), jnp.float32)
    colors_bxpx3 = jax.random.uniform(k2, (B, 8, 3), jnp.float32)

    camera_rot = jnp.stack([jnp.eye(3, dtype=jnp.float32)] * B, axis=0)       # (B, 3, 3)
    camera_pos = jnp.tile(jnp.array([[0.0, 0.0, 2.5]], jnp.float32), (B, 1))  # (B, 3)
    tanfov = math.tan(math.radians(45.0) / 2.0)
    camera_proj = jnp.array([[1.0 / tanfov], [1.0 / tanfov], [-1.0]], jnp.float32)

    imrender, improb, normal1, hardmask = vcrender_forward(
        points_bxpx3, faces_fx3, camera_rot, camera_pos, camera_proj,
        colors_bxpx3, H, W)

    jax.block_until_ready((imrender, improb, normal1, hardmask))
    assert imrender.shape == (B, H, W, 3)
    assert improb.shape == (B, H, W, 1)
    assert normal1.shape == (B, faces_fx3.shape[0], 3)
    assert hardmask.shape == (B, H, W, 1)
    assert bool(jnp.all(jnp.isfinite(imrender))) and bool(jnp.all(jnp.isfinite(improb)))
    assert bool(jnp.all(jnp.isfinite(normal1))) and bool(jnp.all(jnp.isfinite(hardmask)))
    print("KERNEL_OK")
</pallas_src>

<mosaic_0001>
module attributes {stable_mosaic.version = 11 : i64} {
  func.func @_project_kernel(%arg0: i32, %arg1: memref<1x3x8xf32, #tpu.memory_space<vmem>>, %arg2: memref<1x3x3xf32, #tpu.memory_space<vmem>>, %arg3: memref<1x3x1xf32, #tpu.memory_space<vmem>>, %arg4: memref<3x1xf32, #tpu.memory_space<vmem>>, %arg5: memref<1x3x8xf32, #tpu.memory_space<vmem>>, %arg6: memref<1x2x8xf32, #tpu.memory_space<vmem>>) attributes {dimension_semantics = [#tpu.dimension_semantics<parallel>], iteration_bounds = array<i64: 2>, scalar_prefetch = 0 : i64, scratch_operands = 0 : i64, tpu.core_type = #tpu.core_type<tc>, window_params = [{transform_indices = @transform_0, window_bounds = array<i64: 1, 3, 8>}, {transform_indices = @transform_1, window_bounds = array<i64: 1, 3, 3>}, {transform_indices = @transform_2, window_bounds = array<i64: 1, 3, 1>}, {pipeline_mode = #tpu.pipeline_mode<synchronous>, transform_indices = @transform_3, window_bounds = array<i64: 3, 1>}, {transform_indices = @transform_4, window_bounds = array<i64: 1, 3, 8>}, {transform_indices = @transform_5, window_bounds = array<i64: 1, 2, 8>}]} {
    %c0 = arith.constant 0 : index
    %c0_0 = arith.constant 0 : index
    %c0_1 = arith.constant 0 : index
    %0 = vector.load %arg1[%c0, %c0_0, %c0_1] : memref<1x3x8xf32, #tpu.memory_space<vmem>>, vector<1x3x8xf32>
    %1 = vector.shape_cast %0 : vector<1x3x8xf32> to vector<3x8xf32>
    %c0_2 = arith.constant 0 : index
    %c0_3 = arith.constant 0 : index
    %c0_4 = arith.constant 0 : index
    %2 = vector.load %arg2[%c0_2, %c0_3, %c0_4] : memref<1x3x3xf32, #tpu.memory_space<vmem>>, vector<1x3x3xf32>
    %3 = vector.shape_cast %2 : vector<1x3x3xf32> to vector<3x3xf32>
    %c0_5 = arith.constant 0 : index
    %c0_6 = arith.constant 0 : index
    %c0_7 = arith.constant 0 : index
    %4 = vector.load %arg3[%c0_5, %c0_6, %c0_7] : memref<1x3x1xf32, #tpu.memory_space<vmem>>, vector<1x3x1xf32>
    %5 = vector.shape_cast %4 : vector<1x3x1xf32> to vector<3x1xf32>
    %c0_8 = arith.constant 0 : index
    %c0_9 = arith.constant 0 : index
    %6 = vector.load %arg4[%c0_8, %c0_9] : memref<3x1xf32, #tpu.memory_space<vmem>>, vector<3x1xf32>
    %7 = vector.broadcast %5 : vector<3x1xf32> to vector<3x8xf32>
    %8 = arith.subf %1, %7 : vector<3x8xf32>
    %9 = vector.extract_strided_slice %8 {offsets = [0, 0], sizes = [1, 8], strides = [1, 1]} : vector<3x8xf32> to vector<1x8xf32>
    %10 = vector.extract_strided_slice %8 {offsets = [1, 0], sizes = [1, 8], strides = [1, 1]} : vector<3x8xf32> to vector<1x8xf32>
    %11 = vector.extract_strided_slice %8 {offsets = [2, 0], sizes = [1, 8], strides = [1, 1]} : vector<3x8xf32> to vector<1x8xf32>
    %12 = vector.extract_strided_slice %3 {offsets = [0, 0], sizes = [1, 1], strides = [1, 1]} : vector<3x3xf32> to vector<1x1xf32>
    %13 = vector.broadcast %12 : vector<1x1xf32> to vector<1x8xf32>
    %14 = arith.mulf %13, %9 : vector<1x8xf32>
    %15 = vector.extract_strided_slice %3 {offsets = [0, 1], sizes = [1, 1], strides = [1, 1]} : vector<3x3xf32> to vector<1x1xf32>
    %16 = vector.broadcast %15 : vector<1x1xf32> to vector<1x8xf32>
    %17 = arith.mulf %16, %10 : vector<1x8xf32>
    %18 = arith.addf %14, %17 : vector<1x8xf32>
    %19 = vector.extract_strided_slice %3 {offsets = [0, 2], sizes = [1, 1], strides = [1, 1]} : vector<3x3xf32> to vector<1x1xf32>
    %20 = vector.broadcast %19 : vector<1x1xf32> to vector<1x8xf32>
    %21 = arith.mulf %20, %11 : vector<1x8xf32>
    %22 = arith.addf %18, %21 : vector<1x8xf32>
    %23 = vector.extract_strided_slice %3 {offsets = [1, 0], sizes = [1, 1], strides = [1, 1]} : vector<3x3xf32> to vector<1x1xf32>
    %24 = vector.broadcast %23 : vector<1x1xf32> to vector<1x8xf32>
    %25 = arith.mulf %24, %9 : vector<1x8xf32>
    %26 = vector.extract_strided_slice %3 {offsets = [1, 1], sizes = [1, 1], strides = [1, 1]} : vector<3x3xf32> to vector<1x1xf32>
    %27 = vector.broadcast %26 : vector<1x1xf32> to vector<1x8xf32>
    %28 = arith.mulf %27, %10 : vector<1x8xf32>
    %29 = arith.addf %25, %28 : vector<1x8xf32>
    %30 = vector.extract_strided_slice %3 {offsets = [1, 2], sizes = [1, 1], strides = [1, 1]} : vector<3x3xf32> to vector<1x1xf32>
    %31 = vector.broadcast %30 : vector<1x1xf32> to vector<1x8xf32>
    %32 = arith.mulf %31, %11 : vector<1x8xf32>
    %33 = arith.addf %29, %32 : vector<1x8xf32>
    %34 = vector.extract_strided_slice %3 {offsets = [2, 0], sizes = [1, 1], strides = [1, 1]} : vector<3x3xf32> to vector<1x1xf32>
    %35 = vector.broadcast %34 : vector<1x1xf32> to vector<1x8xf32>
    %36 = arith.mulf %35, %9 : vector<1x8xf32>
    %37 = vector.extract_strided_slice %3 {offsets = [2, 1], sizes = [1, 1], strides = [1, 1]} : vector<3x3xf32> to vector<1x1xf32>
    %38 = vector.broadcast %37 : vector<1x1xf32> to vector<1x8xf32>
    %39 = arith.mulf %38, %10 : vector<1x8xf32>
    %40 = arith.addf %36, %39 : vector<1x8xf32>
    %41 = vector.extract_strided_slice %3 {offsets = [2, 2], sizes = [1, 1], strides = [1, 1]} : vector<3x3xf32> to vector<1x1xf32>
    %42 = vector.broadcast %41 : vector<1x1xf32> to vector<1x8xf32>
    %43 = arith.mulf %42, %11 : vector<1x8xf32>
    %44 = arith.addf %40, %43 : vector<1x8xf32>
    %c0_10 = arith.constant 0 : index
    %c0_11 = arith.constant 0 : index
    %c0_12 = arith.constant 0 : index
    %45 = vector.load %arg5[%c0_10, %c0_11, %c0_12] : memref<1x3x8xf32, #tpu.memory_space<vmem>>, vector<1x1x8xf32>
    %46 = vector.shape_cast %45 : vector<1x1x8xf32> to vector<1x8xf32>
    %47 = vector.shape_cast %22 : vector<1x8xf32> to vector<1x1x8xf32>
    tpu.vector_store %arg5[%c0_10, %c0_11, %c0_12], %47 {strides = array<i32>} : memref<1x3x8xf32, #tpu.memory_space<vmem>>, vector<1x1x8xf32>,
    %c0_13 = arith.constant 0 : index
    %c1 = arith.constant 1 : index
    %c0_14 = arith.constant 0 : index
    %48 = vector.load %arg5[%c0_13, %c1, %c0_14] : memref<1x3x8xf32, #tpu.memory_space<vmem>>, vector<1x1x8xf32>
    %49 = vector.shape_cast %48 : vector<1x1x8xf32> to vector<1x8xf32>
    %50 = vector.shape_cast %33 : vector<1x8xf32> to vector<1x1x8xf32>
    tpu.vector_store %arg5[%c0_13, %c1, %c0_14], %50 {strides = array<i32>} : memref<1x3x8xf32, #tpu.memory_space<vmem>>, vector<1x1x8xf32>,
    %c0_15 = arith.constant 0 : index
    %c2 = arith.constant 2 : index
    %c0_16 = arith.constant 0 : index
    %51 = vector.load %arg5[%c0_15, %c2, %c0_16] : memref<1x3x8xf32, #tpu.memory_space<vmem>>, vector<1x1x8xf32>
    %52 = vector.shape_cast %51 : vector<1x1x8xf32> to vector<1x8xf32>
    %53 = vector.shape_cast %44 : vector<1x8xf32> to vector<1x1x8xf32>
    tpu.vector_store %arg5[%c0_15, %c2, %c0_16], %53 {strides = array<i32>} : memref<1x3x8xf32, #tpu.memory_space<vmem>>, vector<1x1x8xf32>,
    %54 = vector.extract_strided_slice %6 {offsets = [2, 0], sizes = [1, 1], strides = [1, 1]} : vector<3x1xf32> to vector<1x1xf32>
    %55 = vector.broadcast %54 : vector<1x1xf32> to vector<1x8xf32>
    %56 = arith.mulf %44, %55 : vector<1x8xf32>
    %57 = tpu.reciprocal %56 {approx = true} : vector<1x8xf32> -> vector<1x8xf32>
    %58 = arith.mulf %56, %57 : vector<1x8xf32>
    %cst = arith.constant 2.000000e+00 : f32
    %59 = vector.broadcast %cst : f32 to vector<1x8xf32>
    %60 = arith.subf %59, %58 : vector<1x8xf32>
    %61 = arith.mulf %57, %60 : vector<1x8xf32>
    %62 = vector.extract_strided_slice %6 {offsets = [0, 0], sizes = [1, 1], strides = [1, 1]} : vector<3x1xf32> to vector<1x1xf32>
    %63 = vector.broadcast %62 : vector<1x1xf32> to vector<1x8xf32>
    %64 = arith.mulf %22, %63 : vector<1x8xf32>
    %65 = arith.mulf %64, %61 : vector<1x8xf32>
    %c0_17 = arith.constant 0 : index
    %c0_18 = arith.constant 0 : index
    %c0_19 = arith.constant 0 : index
    %66 = vector.load %arg6[%c0_17, %c0_18, %c0_19] : memref<1x2x8xf32, #tpu.memory_space<vmem>>, vector<1x1x8xf32>
    %67 = vector.shape_cast %66 : vector<1x1x8xf32> to vector<1x8xf32>
    %68 = vector.shape_cast %65 : vector<1x8xf32> to vector<1x1x8xf32>
    tpu.vector_store %arg6[%c0_17, %c0_18, %c0_19], %68 {strides = array<i32>} : memref<1x2x8xf32, #tpu.memory_space<vmem>>, vector<1x1x8xf32>,
    %69 = vector.extract_strided_slice %6 {offsets = [1, 0], sizes = [1, 1], strides = [1, 1]} : vector<3x1xf32> to vector<1x1xf32>
    %70 = vector.broadcast %69 : vector<1x1xf32> to vector<1x8xf32>
    %71 = arith.mulf %33, %70 : vector<1x8xf32>
    %72 = arith.mulf %71, %61 : vector<1x8xf32>
    %c0_20 = arith.constant 0 : index
    %c1_21 = arith.constant 1 : index
    %c0_22 = arith.constant 0 : index
    %73 = vector.load %arg6[%c0_20, %c1_21, %c0_22] : memref<1x2x8xf32, #tpu.memory_space<vmem>>, vector<1x1x8xf32>
    %74 = vector.shape_cast %73 : vector<1x1x8xf32> to vector<1x8xf32>
    %75 = vector.shape_cast %72 : vector<1x8xf32> to vector<1x1x8xf32>
    tpu.vector_store %arg6[%c0_20, %c1_21, %c0_22], %75 {strides = array<i32>} : memref<1x2x8xf32, #tpu.memory_space<vmem>>, vector<1x1x8xf32>,
    return
  }
  func.func @transform_0(%arg0: i32) -> (i32, i32, i32) {
    %c0_i32 = arith.constant 0 : i32
    %c0_i32_0 = arith.constant 0 : i32
    %c0_i32_1 = arith.constant 0 : i32
    return %arg0, %c0_i32, %c0_i32_0 : i32, i32, i32
  }
  func.func @transform_1(%arg0: i32) -> (i32, i32, i32) {
    %c0_i32 = arith.constant 0 : i32
    %c0_i32_0 = arith.constant 0 : i32
    %c0_i32_1 = arith.constant 0 : i32
    return %arg0, %c0_i32, %c0_i32_0 : i32, i32, i32
  }
  func.func @transform_2(%arg0: i32) -> (i32, i32, i32) {
    %c0_i32 = arith.constant 0 : i32
    %c0_i32_0 = arith.constant 0 : i32
    %c0_i32_1 = arith.constant 0 : i32
    return %arg0, %c0_i32, %c0_i32_0 : i32, i32, i32
  }
  func.func @transform_3(%arg0: i32) -> (i32, i32) {
    %c0_i32 = arith.constant 0 : i32
    %c0_i32_0 = arith.constant 0 : i32
    %c0_i32_1 = arith.constant 0 : i32
    return %c0_i32, %c0_i32_0 : i32, i32
  }
  func.func @transform_4(%arg0: i32) -> (i32, i32, i32) {
    %c0_i32 = arith.constant 0 : i32
    %c0_i32_0 = arith.constant 0 : i32
    %c0_i32_1 = arith.constant 0 : i32
    return %arg0, %c0_i32, %c0_i32_0 : i32, i32, i32
  }
  func.func @transform_5(%arg0: i32) -> (i32, i32, i32) {
    %c0_i32 = arith.constant 0 : i32
    %c0_i32_0 = arith.constant 0 : i32
    %c0_i32_1 = arith.constant 0 : i32
    return %arg0, %c0_i32, %c0_i32_0 : i32, i32, i32
  }
}

</mosaic_0001>

<bundles_post_ra>
// kernel: tpu_custom_call.1
= control target key start
LH: loop header
LB: loop body
LE: loop exit
PB: predicated region body
PF: predicated region fallthrough
CT: control target
= control target key end

     0   :  { %11 = vsyncpa [#allocation3], 0  ;;  %s747_s0 = inlined_call_operand.vmem [shape: f32[2,3,8], index: 0, kind: input, shape index: {}]   ;;  %s748_s1 = inlined_call_operand.vmem [shape: f32[2,3,3], index: 1, kind: input, shape index: {}]   ;;  %s749_s2 = inlined_call_operand.vmem [shape: f32[2,3,1], index: 2, kind: input, shape index: {}]   ;;  %s750_s3 = inlined_call_operand.vmem [shape: f32[3,1], index: 3, kind: input, shape index: {}]   ;;  %s751_s4 = inlined_call_operand.vmem [shape: f32[2,3,8], index: 4, kind: output, shape index: {0}]   ;;  %s752_s5 = inlined_call_operand.hbm [shape: f32[2,2,8], index: 5, kind: output, shape index: {1}]  }
   0x1   :  { %13 = vsyncpa [#allocation3 + $0x1], 0  ;;  %s625_s18 = smov 0   ;;  %s627_s19 = smov 0  }
   0x2   :  { %s629_s20 = smov 0   ;;  %s631_s21 = smov 0  }
   0x3 LB: > { %s646_s22 = sadd.s32 4294967295, %s589_s21   ;;  %s467_s23 = sadd.s32 4294967294, %s589_s21   ;;  %s589_s21 = sphi %s631_s21, %s758_s21   ;;  %s585_s20 = sphi %s629_s20, %s757_s20   ;;  %s581_s19 = sphi %s627_s19, %s756_s19   ;;  %s577_s18 = sphi %s625_s18, %s755_s18  }
   0x4   : > { %s650_s24 = sadd.s32 1, %s589_s21   ;;  %s151_s25 = sadd.s32 1, %s585_s20 }
   0x5   : > { %s148_s26 = ssub.s32 %s589_s21, %s650_s24  ;;  %p161_p0 = scmp.ne.s32.totalorder %s585_s20, %s581_s19 }
   0x6   : > { %p149_p1 = scmp.eq.s32.totalorder %s148_s26, 0  ;;  %p162_p2 = scmp.eq.s32.totalorder %s646_s22, 1 }
   0x7   : > { %p167_p3 = scmp.ne.s32.totalorder %s581_s19, %s577_s18  ;;  %p168_p4 = scmp.eq.s32.totalorder %s467_s23, 1 }
   0x8   : > { %s661_s27 = scalar_select %p149_p1, %s585_s20, %s151_s25  }
   0x9   : > { %p663_p5 = por %p162_p2, %p161_p0  ;;  %p667_p6 = por %p168_p4, %p167_p3 }
   0xa   : > { %p470_p7 = scmp.ge.s32.totalorder %s589_s21, 1  ;;  %p210_p8 = scmp.lt.s32.totalorder %s589_s21, 3 }
   0xc   : > { %p211_p9 = pnand %p470_p7, %p210_p8 }
   0xd   : > { %p249_p10 = scmp.lt.s32.totalorder (!%p211_p9), %s646_s22, 1  ;;  %v591_v0 = vmov (!%p211_p9), 1   ;;  %v592_v1 = vmov (!%p211_p9), 0   ;;  %v593_v4 = vmov (!%p211_p9), 2   ;;  %v268_v5 = vld [vmem:[%s750_s3] sm:$0x7] (!%p211_p9) }
   0xe   : > { %214 = sbr.rel (%p211_p9) target bundleno = 203 (0xcb), region = 36  ;;  %523 = vset.pattern.permute.xlu1 (!%p211_p9), %v591_v0  ;;  %522 = vset.pattern.permute.xlu0 (!%p211_p9), %v592_v1  ;;  %vm312_vm0 = vcmask (!%p211_p9), 57344   ;;  %vm314_vm1 = vcmask (!%p211_p9), 58369   ;;  %vm316_vm2 = vcmask (!%p211_p9), 59394   ;;  %s477_s7 = sshll.u32 (!%p211_p9), %s646_s22, 5 }
   0xf   : > { %s594_s14 = smov (!%p211_p9), [#allocation2]  }
  0x10   : > { %s531_s15 = sshll.u32 (!%p211_p9), %s594_s14, 4  ;;  %s532_s15 = int_to_ptr.vmem [resolvable:$false] %s531_s15 }
  0x11   : > { %s533_s16 = scalar_lea.vmem (!%p211_p9), %s532_s15, 64 }
  0x15   : > { %s250_s30 = scalar_select %p249_p10, %s646_s22, 1 }
  0x17   : > { %s675_s6 = sshll.u32 %s250_s30, 2  ;;  %s246_s30 = sand.u32 1, %s581_s19  }
  0x18   : > { %s260_s9 = scalar_lea.vmem %s749_s2, %s675_s6  ;;  %s256_s12 = scalar_lea.vmem %s748_s1, %s675_s6 }
  0x19   : > { %v267_v2 = vld [vmem:[%s260_s9] sm:$0x7]  ;;  %s252_s17 = scalar_lea.vmem %s747_s0, %s675_s6  ;;  %s264_s26 = scalar_lea.vmem %s751_s4, %s675_s6 }
  0x1a   : > { %271 = vperm.xlu0 %522, %v267_v2   ;;  %v266_v3 = vld [vmem:[%s256_s12] sm:$0x7]  ;;  %s471_s6 = sshll.u32 %s246_s30, 1  ;;  %s703_s12 = scalar_lea.hbm %s752_s5, %s477_s7 }
  0x1b   : > { %282 = vperm.xlu1 %523, %v266_v3   ;;  %v265_v6 = vld [vmem:[%s252_s17] sm:$0x7]  ;;  %s248_s8 = scalar_lea.vmem [#allocation2], %s471_s6  ;;  %s344_s22 = scalar_lea.sflag [#allocation3], %s246_s30 }
  0x1c   : > { %s360_s9 = sshll.u32 %s248_s8, 4  ;;  %s705_s9 = int_to_ptr.vmem [resolvable:$true] %s360_s9 }
  0x1d   : > { %s527_s13 = scalar_lea.vmem %s705_s9, 32  ;;  %p534_p0 = scmp.lt.s32.totalorder %s705_s9, %s532_s15 }
  0x1e   : > { %277 = vperm.xlu0 %522, %v266_v3   ;;  %p528_p11 = scmp.ne.s32.totalorder %s705_s9, %s527_s13  ;;  %p535_p1 = scmp.lt.s32.totalorder %s533_s16, %s527_s13 }
  0x1f   : > { %524 = vset.pattern.permute.xlu1 %v593_v4 }
  0x20   : > { %291 = vperm.xlu1 %524, %v266_v3   ;;  %p529_p12 = pnand %p528_p11, %p663_p5  ;;  %p536_p2 = por %p535_p1, %p534_p0 }
  0x22   : > { %320 = vperm.xlu0 %522, %v268_v5   ;;  %p530_p13 = pneg %p529_p12 }
  0x24   : > { %p537_p3 = pnand %p536_p2, %p530_p13 }
  0x99   : > { %v272_v7 = vpop.permute.xlu0 %271 }
  0x9a   : > { %v274_v8 = vsub.f32 %v265_v6, %v272_v7  ;;  %v283_v9 = vpop.permute.xlu1 %282 }
  0x9c   : > { %v286_v10 = vrot.slane %v274_v8, 1  ;;  %v298_v11 = vrot.slane %v274_v8, 7  ;;  %v305_v12 = vrot.slane %v274_v8, 6  ;;  %v301_v13 = vmul.f32 %v283_v9, %v274_v8 }
  0x9d   : > { %v278_v14 = vpop.permute.xlu0 %277  ;;  %v294_v15 = vrot.slane %v274_v8, 2 }
  0x9e   : > { %v288_v16 = vmul.f32 %v286_v10, %v283_v9  ;;  %v308_v17 = vmul.f32 %v298_v11, %v283_v9  ;;  %v280_v18 = vmul.f32 %v278_v14, %v274_v8  ;;  %v300_v19 = vmul.f32 %v298_v11, %v278_v14 }
  0x9f   : > { %v307_v20 = vmul.f32 %v305_v12, %v278_v14  ;;  %v292_v21 = vpop.permute.xlu1 %291 }
  0xa0   : > { %v289_v22 = vadd.f32 %v288_v16, %v280_v18  ;;  %v302_v23 = vadd.f32 %v301_v13, %v300_v19  ;;  %v296_v24 = vmul.f32 %v294_v15, %v292_v21  ;;  %v303_v25 = vmul.f32 %v292_v21, %v286_v10 }
  0xa1   : > { %v309_v26 = vadd.f32 %v308_v17, %v307_v20  ;;  %v310_v27 = vmul.f32 %v292_v21, %v274_v8  ;;  %v321_v31 = vpop.permute.xlu0 %320 }
  0xa2   : > { %v297_v28 = vadd.f32 %v296_v24, %v289_v22  ;;  %v304_v29 = vadd.f32 %v303_v25, %v302_v23 }
  0xa3   : > { %v311_v30 = vadd.f32 %v310_v27, %v309_v26 }
  0xa4   : > { %313 = vst.msk [vmem:[%s264_s26] sm:$0x1] %vm312_vm0, %v297_v28  ;;  %v328_v37 = vmul.f32 %v321_v31, %v297_v28  ;;  %v334_v39 = vmul.f32 %v321_v31, %v304_v29 }
  0xa5   : > { %315 = vst.msk [vmem:[%s264_s26] sm:$0x2] %vm314_vm1, %v304_v29  ;;  %v323_v32 = vmul.f32 %v321_v31, %v311_v30 }
  0xa6   : > { %317 = vst.msk [vmem:[%s264_s26] sm:$0x4] %vm316_vm2, %v311_v30 }
  0xa7   : > { %525 = vrcp.f32 %v323_v32 }
  0xb1   : > { %v526_v33 = vpop.eup %525 }
  0xb2   : > { %v325_v34 = vmul.f32 %v526_v33, %v323_v32 }
  0xb4   : > { %v326_v35 = vsub.f32 2.0, %v325_v34 }
  0xb6   : > { %v327_v36 = vmul.f32 %v526_v33, %v326_v35 }
  0xb8   : > { %v330_v38 = vrot.slane %v327_v36, 2  ;;  %v335_v40 = vrot.slane %v327_v36, 1 }
  0xba   : > { %v332_v41 = vmul.f32 %v330_v38, %v328_v37  ;;  %v337_v42 = vmul.f32 %v335_v40, %v334_v39 }
  0xbc   : > { %333 = vst.msk [vmem:[%s248_s8] sm:$0x1] %vm312_vm0, %v332_v41 }
  0xbd   : > { %338 = vst.msk [vmem:[%s248_s8] sm:$0x2] %vm314_vm1, %v337_v42 }
  0xbe   : > { %540 = shalt.err (!%p537_p3)
}
  0xbf   : > { %s541_s17 = scalar_lea.hbm %s703_s12, 32  ;;  %s545_s26 = scalar_lea.hbm %s752_s5, 64 }
  0xc0   : > { %p542_p4 = scmp.ne.s32.totalorder %s703_s12, %s541_s17  ;;  %p546_p9 = scmp.lt.u32.totalorder %s703_s12, %s752_s5 }
  0xc1   : > { %p547_p10 = scmp.lt.u32.totalorder %s545_s26, %s541_s17  ;;  %p549_p12 = scmp.lt.u32.totalorder %s541_s17, %s703_s12 }
  0xc2   : > { %p543_p7 = pnand %p542_p4, %p663_p5 }
  0xc3   : > { %p548_p11 = por %p547_p10, %p546_p9 }
  0xc4   : > { %p544_p8 = pneg %p543_p7 }
  0xc5   : > { %p550_p13 = por %p549_p12, %p548_p11 }
  0xc7   : > { %p551_p0 = pnand %p550_p13, %p544_p8 }
  0xc9   : > { %554 = shalt.err (!%p551_p0)
}
  0xca   : > { %480 = dma.vmem_to_hbm [thread:$0]  (%p663_p5), %s705_s9, 32, %s703_s12, %s344_s22  }
  0xcb PF: > { %p486_p1 = scmp.ge.s32.totalorder %s589_s21, 2  ;;  %s379_s7 = sand.u32 1, %s577_s18  }
  0xcc   : > { %s380_s8 = scalar_lea.sflag [#allocation3], %s379_s7 }
  0xcd   : > { %p483_p2 = pnand %p486_p1, %p667_p6 }
  0xcf   : > { %572 = dma.done.wait (!%p483_p2), %s380_s8, 32  }
  0xd0   : > { %574 = vsyncadd (!%p483_p2), %s380_s8, 4294967264  ;;  %p16_p3 = scmp.ge.s32.totalorder %s650_s24, 4   ;;  %s755_s18 = smov %s581_s19 }
  0xd1   : > { %s756_s19 = smov %s585_s20  ;;  %s757_s20 = smov %s661_s27 }
  0xd2   : > { %s758_s21 = smov %s650_s24  ;;  %18 = sbr.rel (!%p16_p3) target bundleno = 3 (0x3), region = 89 }
  0xd9   :  { %385 = vsyncpa [#allocation3], 1 }
  0xda   :  { %387 = vsyncpa [#allocation3 + $0x1], 1 }

</bundles_post_ra>
